<compile_context>
chip_gen: v5e
topology: v5e:2x2
jax: 0.10.0
libtpu: 0.0.40
codegen_flags: <defaults>
</compile_context>

<pallas_src>
import jax
import jax.numpy as jnp
from jax.experimental import pallas as pl
from jax.experimental.pallas import tpu as pltpu


def _disparity_regression_kernel(x_ref, o_ref):
    # x_ref: (D, tH, tW) in VMEM (input dtype); o_ref: (tH, tW) float32
    D = x_ref.shape[0]

    def body(d, acc):
        w = jax.lax.convert_element_type(d, jnp.float32)
        return acc + x_ref[d].astype(jnp.float32) * w

    init = jnp.zeros(o_ref.shape, jnp.float32)
    if D <= 32:
        acc = jax.lax.fori_loop(0, D, body, init, unroll=True)
    else:
        acc = jax.lax.fori_loop(0, D, body, init, unroll=8)
    o_ref[...] = acc


def _choose_tiles(D, H, W, itemsize):
    # Lane-dense W tile: full W when small / not 128-divisible, else 512 lanes.
    if W > 512 and W % 128 == 0:
        tW = 512
    else:
        tW = W
    # Sublane granularity depends on dtype packing (f32: 8, bf16: 16, 8-bit: 32).
    sub = 8 if itemsize >= 4 else (16 if itemsize == 2 else 32)
    # ~4 MiB per input block -> double-buffered inputs + output fit every
    # generation's scoped VMEM (v5e 16 MiB default, v6e 32 MiB, v7x 32 MiB).
    budget = 4 * 1024 * 1024
    tH = budget // max(1, D * tW * itemsize)
    if tH >= H:
        tH = H
    else:
        tH = max(sub, (tH // sub) * sub)
        tH = min(tH, H)
    return tH, tW


def disparity_regression(x: jax.Array, maxdisp: int) -> jax.Array:
    """x: [B, maxdisp, H, W] (float32 or bfloat16) -> [B, H, W] float32."""
    B, D, H, W = x.shape
    assert D == maxdisp, f"channel dim {D} must equal maxdisp {maxdisp}"

    itemsize = jnp.dtype(x.dtype).itemsize
    tH, tW = _choose_tiles(D, H, W, itemsize)

    grid = (B, pl.cdiv(H, tH), pl.cdiv(W, tW))

    in_block_bytes = D * tH * tW * itemsize
    out_block_bytes = tH * tW * 4
    vmem_bytes = 2 * in_block_bytes + 2 * out_block_bytes + (2 << 20)
    vmem_bytes = int(min(max(vmem_bytes, 16 << 20), 48 << 20))

    return pl.pallas_call(
        _disparity_regression_kernel,
        out_shape=jax.ShapeDtypeStruct((B, H, W), jnp.float32),
        grid_spec=pl.GridSpec(
            grid=grid,
            in_specs=[
                pl.BlockSpec(
                    (None, D, tH, tW),  # batch dim squeezed out of the kernel ref
                    lambda b, i, j: (b, 0, i, j),
                )
            ],
            out_specs=pl.BlockSpec(
                (None, tH, tW),
                lambda b, i, j: (b, i, j),
            ),
        ),
        compiler_params=pltpu.CompilerParams(
            dimension_semantics=("parallel", "parallel", "parallel"),
            vmem_limit_bytes=vmem_bytes,
        ),
    )(x)


if __name__ == "__main__":
    key = jax.random.PRNGKey(0)
    B, maxdisp, H, W = 2, 8, 16, 16

    # Deterministic example input: softmax over the disparity axis, like the
    # cost-volume probabilities this module normally consumes.
    logits = jax.random.normal(key, (B, maxdisp, H, W), dtype=jnp.float32)
    x = jax.nn.softmax(logits, axis=1)

    out = disparity_regression(x, maxdisp)
    out = jax.block_until_ready(out)

    # Pure-JAX reference check (float32 path).
    disp = jnp.arange(maxdisp, dtype=jnp.float32).reshape(1, maxdisp, 1, 1)
    ref = jnp.sum(x * disp, axis=1)
    assert out.shape == (B, H, W)
    assert out.dtype == jnp.float32
    assert jnp.allclose(out, ref, atol=1e-5, rtol=1e-5)

    # bf16 input path (memory-bound: half the HBM bytes), f32 accumulation.
    x_bf16 = x.astype(jnp.bfloat16)
    out_bf16 = jax.block_until_ready(disparity_regression(x_bf16, maxdisp))
    ref_bf16 = jnp.sum(x_bf16.astype(jnp.float32) * disp, axis=1)
    assert out_bf16.dtype == jnp.float32
    assert jnp.allclose(out_bf16, ref_bf16, atol=1e-4, rtol=1e-4)

    print("KERNEL_OK")
</pallas_src>

<mosaic_0001>
module attributes {stable_mosaic.version = 11 : i64} {
  func.func @_disparity_regression_kernel(%arg0: i32, %arg1: i32, %arg2: i32, %arg3: memref<1x8x16x16xf32, #tpu.memory_space<vmem>>, %arg4: memref<1x16x16xf32, #tpu.memory_space<vmem>>) attributes {dimension_semantics = [#tpu.dimension_semantics<parallel>, #tpu.dimension_semantics<parallel>, #tpu.dimension_semantics<parallel>], iteration_bounds = array<i64: 2, 1, 1>, scalar_prefetch = 0 : i64, scratch_operands = 0 : i64, tpu.core_type = #tpu.core_type<tc>, window_params = [{transform_indices = @transform_0, window_bounds = array<i64: 1, 8, 16, 16>}, {transform_indices = @transform_1, window_bounds = array<i64: 1, 16, 16>}]} {
    %cst = arith.constant 0.000000e+00 : f32
    %0 = vector.broadcast %cst : f32 to vector<16x16xf32>
    %c0_i32 = arith.constant 0 : i32
    %1 = arith.sitofp %c0_i32 : i32 to f32
    %c0 = arith.constant 0 : index
    %2 = arith.index_cast %c0_i32 : i32 to index
    %c0_0 = arith.constant 0 : index
    %c0_1 = arith.constant 0 : index
    %3 = vector.load %arg3[%c0, %2, %c0_0, %c0_1] : memref<1x8x16x16xf32, #tpu.memory_space<vmem>>, vector<1x1x16x16xf32>
    %4 = vector.shape_cast %3 : vector<1x1x16x16xf32> to vector<16x16xf32>
    %5 = vector.broadcast %1 : f32 to vector<16x16xf32>
    %6 = arith.mulf %4, %5 : vector<16x16xf32>
    %7 = arith.addf %0, %6 : vector<16x16xf32>
    %c1_i32 = arith.constant 1 : i32
    %8 = arith.sitofp %c1_i32 : i32 to f32
    %c0_2 = arith.constant 0 : index
    %9 = arith.index_cast %c1_i32 : i32 to index
    %c0_3 = arith.constant 0 : index
    %c0_4 = arith.constant 0 : index
    %10 = vector.load %arg3[%c0_2, %9, %c0_3, %c0_4] : memref<1x8x16x16xf32, #tpu.memory_space<vmem>>, vector<1x1x16x16xf32>
    %11 = vector.shape_cast %10 : vector<1x1x16x16xf32> to vector<16x16xf32>
    %12 = vector.broadcast %8 : f32 to vector<16x16xf32>
    %13 = arith.mulf %11, %12 : vector<16x16xf32>
    %14 = arith.addf %7, %13 : vector<16x16xf32>
    %c2_i32 = arith.constant 2 : i32
    %15 = arith.sitofp %c2_i32 : i32 to f32
    %c0_5 = arith.constant 0 : index
    %16 = arith.index_cast %c2_i32 : i32 to index
    %c0_6 = arith.constant 0 : index
    %c0_7 = arith.constant 0 : index
    %17 = vector.load %arg3[%c0_5, %16, %c0_6, %c0_7] : memref<1x8x16x16xf32, #tpu.memory_space<vmem>>, vector<1x1x16x16xf32>
    %18 = vector.shape_cast %17 : vector<1x1x16x16xf32> to vector<16x16xf32>
    %19 = vector.broadcast %15 : f32 to vector<16x16xf32>
    %20 = arith.mulf %18, %19 : vector<16x16xf32>
    %21 = arith.addf %14, %20 : vector<16x16xf32>
    %c3_i32 = arith.constant 3 : i32
    %22 = arith.sitofp %c3_i32 : i32 to f32
    %c0_8 = arith.constant 0 : index
    %23 = arith.index_cast %c3_i32 : i32 to index
    %c0_9 = arith.constant 0 : index
    %c0_10 = arith.constant 0 : index
    %24 = vector.load %arg3[%c0_8, %23, %c0_9, %c0_10] : memref<1x8x16x16xf32, #tpu.memory_space<vmem>>, vector<1x1x16x16xf32>
    %25 = vector.shape_cast %24 : vector<1x1x16x16xf32> to vector<16x16xf32>
    %26 = vector.broadcast %22 : f32 to vector<16x16xf32>
    %27 = arith.mulf %25, %26 : vector<16x16xf32>
    %28 = arith.addf %21, %27 : vector<16x16xf32>
    %c4_i32 = arith.constant 4 : i32
    %29 = arith.sitofp %c4_i32 : i32 to f32
    %c0_11 = arith.constant 0 : index
    %30 = arith.index_cast %c4_i32 : i32 to index
    %c0_12 = arith.constant 0 : index
    %c0_13 = arith.constant 0 : index
    %31 = vector.load %arg3[%c0_11, %30, %c0_12, %c0_13] : memref<1x8x16x16xf32, #tpu.memory_space<vmem>>, vector<1x1x16x16xf32>
    %32 = vector.shape_cast %31 : vector<1x1x16x16xf32> to vector<16x16xf32>
    %33 = vector.broadcast %29 : f32 to vector<16x16xf32>
    %34 = arith.mulf %32, %33 : vector<16x16xf32>
    %35 = arith.addf %28, %34 : vector<16x16xf32>
    %c5_i32 = arith.constant 5 : i32
    %36 = arith.sitofp %c5_i32 : i32 to f32
    %c0_14 = arith.constant 0 : index
    %37 = arith.index_cast %c5_i32 : i32 to index
    %c0_15 = arith.constant 0 : index
    %c0_16 = arith.constant 0 : index
    %38 = vector.load %arg3[%c0_14, %37, %c0_15, %c0_16] : memref<1x8x16x16xf32, #tpu.memory_space<vmem>>, vector<1x1x16x16xf32>
    %39 = vector.shape_cast %38 : vector<1x1x16x16xf32> to vector<16x16xf32>
    %40 = vector.broadcast %36 : f32 to vector<16x16xf32>
    %41 = arith.mulf %39, %40 : vector<16x16xf32>
    %42 = arith.addf %35, %41 : vector<16x16xf32>
    %c6_i32 = arith.constant 6 : i32
    %43 = arith.sitofp %c6_i32 : i32 to f32
    %c0_17 = arith.constant 0 : index
    %44 = arith.index_cast %c6_i32 : i32 to index
    %c0_18 = arith.constant 0 : index
    %c0_19 = arith.constant 0 : index
    %45 = vector.load %arg3[%c0_17, %44, %c0_18, %c0_19] : memref<1x8x16x16xf32, #tpu.memory_space<vmem>>, vector<1x1x16x16xf32>
    %46 = vector.shape_cast %45 : vector<1x1x16x16xf32> to vector<16x16xf32>
    %47 = vector.broadcast %43 : f32 to vector<16x16xf32>
    %48 = arith.mulf %46, %47 : vector<16x16xf32>
    %49 = arith.addf %42, %48 : vector<16x16xf32>
    %c7_i32 = arith.constant 7 : i32
    %50 = arith.sitofp %c7_i32 : i32 to f32
    %c0_20 = arith.constant 0 : index
    %51 = arith.index_cast %c7_i32 : i32 to index
    %c0_21 = arith.constant 0 : index
    %c0_22 = arith.constant 0 : index
    %52 = vector.load %arg3[%c0_20, %51, %c0_21, %c0_22] : memref<1x8x16x16xf32, #tpu.memory_space<vmem>>, vector<1x1x16x16xf32>
    %53 = vector.shape_cast %52 : vector<1x1x16x16xf32> to vector<16x16xf32>
    %54 = vector.broadcast %50 : f32 to vector<16x16xf32>
    %55 = arith.mulf %53, %54 : vector<16x16xf32>
    %56 = arith.addf %49, %55 : vector<16x16xf32>
    %c8_i32 = arith.constant 8 : i32
    %c0_23 = arith.constant 0 : index
    %c0_24 = arith.constant 0 : index
    %c0_25 = arith.constant 0 : index
    %57 = vector.load %arg4[%c0_23, %c0_24, %c0_25] : memref<1x16x16xf32, #tpu.memory_space<vmem>>, vector<1x16x16xf32>
    %58 = vector.shape_cast %57 : vector<1x16x16xf32> to vector<16x16xf32>
    %59 = vector.shape_cast %56 : vector<16x16xf32> to vector<1x16x16xf32>
    tpu.vector_store %arg4[%c0_23, %c0_24, %c0_25], %59 {strides = array<i32>} : memref<1x16x16xf32, #tpu.memory_space<vmem>>, vector<1x16x16xf32>,
    return
  }
  func.func @transform_0(%arg0: i32, %arg1: i32, %arg2: i32) -> (i32, i32, i32, i32) {
    %c0_i32 = arith.constant 0 : i32
    %c0_i32_0 = arith.constant 0 : i32
    return %arg0, %c0_i32, %arg1, %arg2 : i32, i32, i32, i32
  }
  func.func @transform_1(%arg0: i32, %arg1: i32, %arg2: i32) -> (i32, i32, i32) {
    %c0_i32 = arith.constant 0 : i32
    return %arg0, %arg1, %arg2 : i32, i32, i32
  }
}

</mosaic_0001>

<bundles_post_ra>
// kernel: tpu_custom_call.1
= control target key start
LH: loop header
LB: loop body
LE: loop exit
PB: predicated region body
PF: predicated region fallthrough
CT: control target
= control target key end

     0   :  { %6 = vsyncpa [#allocation3], 0  ;;  %s700_s0 = inlined_call_operand.hbm [shape: f32[2,8,16,16], index: 0, kind: input, shape index: {}]   ;;  %s701_s1 = inlined_call_operand.hbm [shape: f32[2,16,16], index: 1, kind: output, shape index: {}]  }
   0x1   :  { %8 = vsyncpa [#allocation3 + $0x1], 0 }
   0x2   :  { %9 = vsyncpa [#allocation4], 0 }
   0x3   :  { %11 = vsyncpa [#allocation4 + $0x1], 0  ;;  %s561_s6 = smov 0   ;;  %s563_s7 = smov 0  }
   0x4   :  { %s565_s8 = smov 0   ;;  %s567_s9 = smov 0  }
   0x5   :  { %s569_s10 = smov 0   ;;  %s571_s11 = smov 0  }
   0x6 LB: > { %s336_s12 = sadd.s32 4294967295, %s545_s11   ;;  %s337_s13 = sadd.s32 4294967294, %s545_s11   ;;  %s545_s11 = sphi %s571_s11, %s17_s11   ;;  %s541_s10 = sphi %s569_s10, %s710_s10   ;;  %s537_s9 = sphi %s567_s9, %s709_s9   ;;  %s533_s8 = sphi %s565_s8, %s708_s8   ;;  %s529_s7 = sphi %s563_s7, %s707_s7   ;;  %s525_s6 = sphi %s561_s6, %s706_s6  }
   0x7   : > { %s36_s14 = sadd.s32 1, %s541_s10  ;;  %s47_s15 = sadd.s32 1, %s533_s8 }
   0x8   : > { %p38_p0 = scmp.ge.s32.totalorder %s36_s14, 2  ;;  %p54_p1 = scmp.ne.s32.totalorder %s533_s8, %s529_s7 }
   0x9   : > { %p55_p2 = scmp.eq.s32.totalorder %s545_s11, 0  ;;  %p60_p3 = scmp.ne.s32.totalorder %s529_s7, %s525_s6 }
   0xa   : > { %s712_s14 = smov (%p38_p0, %s36_s14), 0  ;;  %p61_p5 = scmp.eq.s32.totalorder %s336_s12, 0 }
   0xb   : > { %p602_p4 = por %p55_p2, %p54_p1  ;;  %s40_s17 = ssub.s32 %s541_s10, %s712_s14 }
   0xc   : > { %p88_p6 = scmp.eq.s32.totalorder %s336_s12, 1  ;;  %p45_p7 = scmp.eq.s32.totalorder %s40_s17, 0 }
   0xd   : > { %p608_p8 = por %p61_p5, %p60_p3  ;;  %p94_p10 = scmp.eq.s32.totalorder %s337_s13, 1 }
   0xe   : > { %p612_p9 = por %p88_p6, %p54_p1  ;;  %p339_p12 = scmp.ge.s32.totalorder %s545_s11, 2 }
   0xf   : > { %s617_s20 = scalar_select %p45_p7, %s533_s8, %s47_s15  }
  0x10   : > { %p619_p11 = por %p94_p10, %p60_p3  ;;  %p379_p13 = scmp.lt.s32.totalorder %s545_s11, 2 }
  0x11   : > { %s114_s22 = sand.u32 1, %s533_s8   ;;  %s365_s24 = sshll.u32 %s541_s10, 7 }
  0x12   : > { %s340_s23 = sshll.u32 %s114_s22, 7  ;;  %s126_s27 = scalar_lea.hbm %s700_s0, %s365_s24 }
  0x13   : > { %s118_s28 = scalar_lea.vmem [#allocation2], %s340_s23  ;;  %s127_s30 = sshll.u32 %s126_s27, 4  ;;  %s128_s30 = int_to_ptr.hbm [resolvable:$true] %s127_s30 }
  0x14   : > { %s129_s29 = sshll.u32 %s118_s28, 4  ;;  %p372_p0 = pnand %p379_p13, %p602_p4  ;;  %s130_s29 = int_to_ptr.vmem [resolvable:$true] %s129_s29 }
  0x15   : > { %p343_p1 = scmp.ge.s32.totalorder %s545_s11, 1  ;;  %s115_s2 = scalar_lea.sflag [#allocation3], %s114_s22 }
  0x16   : > { %s547_s3 = smov 128   ;;  %s548_s4 = smov 8  }
  0x17   : > { %374 = dma.hbm_to_vmem [thread:$0]  (!%p372_p0), %s128_s30, 2048, %s130_s29, %s115_s2, %s547_s3, %s547_s3, %s548_s4  }
  0x18   : > { %p137_p2 = scmp.lt.s32.totalorder %s545_s11, 3 }
  0x1a   : > { %p138_p3 = pnand %p343_p1, %p137_p2 }
  0x1b   : > { %s635_s5 = sand.u32 (!%p138_p3), 1, %s529_s7  }
  0x1c   : > { %141 = sbr.rel (%p138_p3) target bundleno = 56 (0x38), region = 24  ;;  %s344_s12 = sshll.u32 (!%p138_p3), %s635_s5, 7 }
  0x1d   : > { %s144_s13 = scalar_lea.sflag (!%p138_p3), [#allocation3], %s635_s5  ;;  %s639_s15 = scalar_lea.vmem (!%p138_p3), [#allocation2], %s344_s12 }
  0x21   : > { %516 = dma.done.wait (%p608_p8), %s144_s13, 2048  }
  0x22   : > { %518 = vsyncadd (%p608_p8), %s144_s13, 4294965248  ;;  %v169_v0 = vld [vmem:[%s639_s15] sm:$0xff]  ;;  %v346_v1 = vld [vmem:[%s639_s15 + $0x10] sm:$0xff]  ;;  %s345_s16 = sshll.u32 %s635_s5, 4  ;;  %s366_s17 = sshll.u32 %s537_s9, 4  ;;  %vm222_vm0 = vcmask 130048  }
  0x23   : > { %v348_v2 = vld [vmem:[%s639_s15 + $0x20] sm:$0xff]  ;;  %v171_v3 = vmul.f32 0.0, %v169_v0  ;;  %v350_v5 = vld [vmem:[%s639_s15 + $0x30] sm:$0xff]  ;;  %v170_v7 = vld [vmem:[%s639_s15 + $0x8] sm:$0xff]  ;;  %s240_s23 = scalar_lea.hbm %s701_s1, %s366_s17  ;;  %s166_s24 = scalar_lea.vmem [#allocation5], %s345_s16 }
  0x24   : > { %v183_v4 = vmul.f32 2.0, %v348_v2  ;;  %v352_v6 = vld [vmem:[%s639_s15 + $0x40] sm:$0xff]  ;;  %v190_v9 = vmul.f32 3.0, %v350_v5  ;;  %v172_v10 = vmul.f32 0.0, %v170_v7  ;;  %v347_v11 = vld [vmem:[%s639_s15 + $0x18] sm:$0xff]  ;;  %v349_v12 = vld [vmem:[%s639_s15 + $0x28] sm:$0xff] }
  0x25   : > { %v178_v8 = vadd.f32 %v346_v1, %v171_v3  ;;  %v351_v13 = vld [vmem:[%s639_s15 + $0x38] sm:$0xff]  ;;  %v354_v14 = vld [vmem:[%s639_s15 + $0x50] sm:$0xff]  ;;  %v184_v15 = vmul.f32 2.0, %v349_v12  ;;  %v353_v16 = vld [vmem:[%s639_s15 + $0x48] sm:$0xff]  ;;  %v197_v18 = vmul.f32 4.0, %v352_v6  ;;  %s241_s25 = sshll.u32 %s166_s24, 4  ;;  %s242_s25 = int_to_ptr.vmem [resolvable:$true] %s241_s25 }
  0x26   : > { %v179_v19 = vadd.f32 %v347_v11, %v172_v10  ;;  %v191_v20 = vmul.f32 3.0, %v351_v13  ;;  %v356_v21 = vld [vmem:[%s639_s15 + $0x60] sm:$0xff]  ;;  %v355_v22 = vld [vmem:[%s639_s15 + $0x58] sm:$0xff]  ;;  %v204_v24 = vmul.f32 5.0, %v354_v14  ;;  %v198_v26 = vmul.f32 4.0, %v353_v16  ;;  %v358_v27 = vld [vmem:[%s639_s15 + $0x70] sm:$0xff] }
  0x27   : > { %v185_v17 = vadd.f32 %v183_v4, %v178_v8  ;;  %v357_v28 = vld [vmem:[%s639_s15 + $0x68] sm:$0xff]  ;;  %v211_v30 = vmul.f32 6.0, %v356_v21  ;;  %v205_v32 = vmul.f32 5.0, %v355_v22  ;;  %v359_v33 = vld [vmem:[%s639_s15 + $0x78] sm:$0xff]  ;;  %v218_v35 = vmul.f32 7.0, %v358_v27  ;;  %s243_s9 = sshll.u32 %s240_s23, 4  ;;  %s244_s9 = int_to_ptr.hbm [resolvable:$true] %s243_s9 }
  0x28   : > { %v186_v25 = vadd.f32 %v184_v15, %v179_v19  ;;  %v212_v37 = vmul.f32 6.0, %v357_v28  ;;  %v219_v40 = vmul.f32 7.0, %v359_v33  ;;  %s226_s26 = scalar_lea.sflag [#allocation4], %s635_s5  ;;  %s477_s27 = sshra.s32 %s244_s9, 4  ;;  %s478_s27 = int_to_ptr.hbm [resolvable:$true] %s477_s27 }
  0x29   : > { %v192_v23 = vadd.f32 %v190_v9, %v185_v17  ;;  %s479_s28 = scalar_lea.hbm %s478_s27, 16  ;;  %s483_s2 = scalar_lea.hbm %s701_s1, 32 }
  0x2a   : > { %v193_v31 = vadd.f32 %v191_v20, %v186_v25  ;;  %p480_p4 = scmp.ne.s32.totalorder %s478_s27, %s479_s28  ;;  %p484_p7 = scmp.lt.s32.totalorder %s478_s27, %s701_s1 }
  0x2b   : > { %v199_v29 = vadd.f32 %v197_v18, %v192_v23  ;;  %p485_p8 = scmp.lt.s32.totalorder %s483_s2, %s479_s28 }
  0x2c   : > { %v200_v36 = vadd.f32 %v198_v26, %v193_v31  ;;  %p481_p5 = pnand %p480_p4, %p612_p9 }
  0x2d   : > { %v206_v34 = vadd.f32 %v204_v24, %v199_v29  ;;  %p486_p10 = por %p485_p8, %p484_p7 }
  0x2e   : > { %v207_v39 = vadd.f32 %v205_v32, %v200_v36  ;;  %p482_p6 = pneg %p481_p5 }
  0x2f   : > { %v213_v38 = vadd.f32 %v211_v30, %v206_v34 }
  0x30   : > { %v214_v42 = vadd.f32 %v212_v37, %v207_v39  ;;  %p487_p13 = pnand %p486_p10, %p482_p6 }
  0x31   : > { %v220_v41 = vadd.f32 %v218_v35, %v213_v38 }
  0x32   : > { %v221_v43 = vadd.f32 %v219_v40, %v214_v42 }
  0x33   : > { %223 = vst.msk [vmem:[%s166_s24] sm:$0xff] %vm222_vm0, %v220_v41 }
  0x34   : > { %224 = vst.msk [vmem:[%s166_s24 + $0x8] sm:$0xff] %vm222_vm0, %v221_v43 }
  0x35   : > { %490 = shalt.err (!%p487_p13)
}
  0x36   : > { %s549_s5 = smov 128   ;;  %s550_s12 = smov 8  }
  0x37   : > { %369 = dma.vmem_to_hbm [thread:$0]  (%p612_p9), %s242_s25, 256, %s244_s9, %s226_s26, %s549_s5, %s549_s5, %s550_s12  }
  0x38 PF: > { %s258_s13 = sand.u32 1, %s525_s6   ;;  %p376_p0 = pnand %p339_p12, %p619_p11 }
  0x39   : > { %s259_s15 = scalar_lea.sflag [#allocation4], %s258_s13 }
  0x3a   : > { %p377_p1 = pneg %p376_p0 }
  0x3c   : > { %520 = dma.done.wait (%p377_p1), %s259_s15, 256  }
  0x3d   : > { %522 = vsyncadd (%p377_p1), %s259_s15, 4294967040  ;;  %s17_s11 = sadd.s32 1, %s545_s11   ;;  %s706_s6 = smov %s529_s7 }
  0x3e   : > { %p14_p2 = scmp.ge.s32.totalorder %s17_s11, 4   ;;  %s707_s7 = smov %s533_s8 }
  0x3f   : > { %s708_s8 = smov %s617_s20  ;;  %s709_s9 = smov %s541_s10 }
  0x40   : > { %s710_s10 = smov %s712_s14  ;;  %16 = sbr.rel (!%p14_p2) target bundleno = 6 (0x6), region = 76 }
  0x45   :  { %265 = vsyncpa [#allocation3], 1 }
  0x46   :  { %267 = vsyncpa [#allocation3 + $0x1], 1 }
  0x47   :  { %268 = vsyncpa [#allocation4], 1 }
  0x48   :  { %270 = vsyncpa [#allocation4 + $0x1], 1 }

</bundles_post_ra>
